<compile_context>
chip_gen: v5e
topology: v5e:2x2
jax: 0.10.0
libtpu: 0.0.40
codegen_flags: <defaults>
</compile_context>

<pallas_src>
import jax
import jax.numpy as jnp
from jax.experimental import pallas as pl
from jax.experimental.pallas import tpu as pltpu

ALPHA = 1.0
GAMMA = 1.0


def _input_fn(x):      # "log1"
    return jnp.log1p(x)


def _output_fn(x):     # "sqrt"
    return jnp.sqrt(x)


def _robust_fn(d):     # "cauchy"
    return ALPHA * jnp.log1p((d * (1.0 / GAMMA)) ** 2)


def _regression_kernel(inp_ref, tgt_ref, mask_ref, out_ref, num_acc, den_acc):
    """Grid: (B, N // tile_n). Axis 0 is batch (parallel), axis 1 tiles N (reduction)."""
    n = pl.program_id(1)

    @pl.when(n == 0)
    def _():
        num_acc[...] = jnp.zeros_like(num_acc)
        den_acc[...] = jnp.zeros_like(den_acc)

    x = inp_ref[...].astype(jnp.float32)          # (C, TN)
    y = tgt_ref[...].astype(jnp.float32)          # (C, TN)
    # log1p(x) - log1p(y) == log1p((x - y) / (1 + y)); saves one transcendental.
    d = jnp.log1p((x - y) / (1.0 + y))
    err = _robust_fn(d)                           # (C, TN)

    m = mask_ref[...].astype(jnp.float32)         # (1, TN)

    # Flat VPU accumulation; channel/lane reductions deferred to the finalize step.
    num_acc[...] += err * m                       # broadcast mask over C
    den_acc[...] += m

    @pl.when(n == pl.num_programs(1) - 1)
    def _():
        c = num_acc.shape[0]
        num = jnp.sum(num_acc[...])                               # sum over C and N
        den = jnp.maximum(jnp.sum(den_acc[...]), 1.0)             # clamp(min=1)
        val = _output_fn(num / (c * den))                         # fold mean-over-C
        out_ref[...] = jnp.broadcast_to(val, out_ref.shape).astype(jnp.float32)


def regression_loss(inp, tgt, mask, *, tile_n=2048):
    """inp/tgt: (B, C, H, W) any float dtype; mask: (B, 1, H, W) bool. Returns (B,) f32."""
    B, C, H, W = inp.shape
    N = H * W
    tile_n = min(tile_n, N)
    assert tile_n % 128 == 0 and N % tile_n == 0, (N, tile_n)

    # No wrapper upcast: stream native dtype; mask as int8 (1 byte/elem).
    inp_f = inp.reshape(B, C, N)
    tgt_f = tgt.reshape(B, C, N)
    mask_i8 = mask.reshape(B, 1, N).astype(jnp.int8)

    grid = (B, N // tile_n)
    out = pl.pallas_call(
        _regression_kernel,
        out_shape=jax.ShapeDtypeStruct((B, 1, 128), jnp.float32),
        grid_spec=pltpu.PrefetchScalarGridSpec(
            num_scalar_prefetch=0,
            grid=grid,
            in_specs=[
                pl.BlockSpec((None, C, tile_n), lambda b, n: (b, 0, n)),
                pl.BlockSpec((None, C, tile_n), lambda b, n: (b, 0, n)),
                pl.BlockSpec((None, 1, tile_n), lambda b, n: (b, 0, n)),
            ],
            out_specs=pl.BlockSpec((None, 1, 128), lambda b, n: (b, 0, 0)),
            scratch_shapes=[
                pltpu.VMEM((C, tile_n), jnp.float32),   # masked-error accumulator
                pltpu.VMEM((1, tile_n), jnp.float32),   # mask-count accumulator
            ],
        ),
        compiler_params=pltpu.CompilerParams(
            dimension_semantics=("parallel", "arbitrary"),
        ),
    )(inp_f, tgt_f, mask_i8)
    return out[:, 0, 0]


def regression_loss_reference(inp, tgt, mask):
    """Pure-JAX reference mirroring the PyTorch forward (two-log1p form)."""
    B, C, H, W = inp.shape
    N = H * W
    x = _input_fn(inp.reshape(B, C, N).astype(jnp.float32))
    y = _input_fn(tgt.reshape(B, C, N).astype(jnp.float32))
    err = _robust_fn(x - y).mean(axis=1)                    # (B, N)
    m = mask.reshape(B, 1, N)[:, 0].astype(jnp.float32)     # (B, N)
    num = (err * m).sum(axis=-1)
    den = jnp.maximum(m.sum(axis=-1), 1.0)
    return _output_fn(num / den)                            # (B,)


if __name__ == "__main__":
    key = jax.random.PRNGKey(0)
    k1, k2, k3 = jax.random.split(key, 3)

    B, C, H, W = 2, 4, 16, 16
    # depth-like strictly-positive inputs (log1p is well-defined)
    inp = jax.random.uniform(k1, (B, C, H, W), jnp.float32, 0.1, 10.0)
    tgt = jax.random.uniform(k2, (B, C, H, W), jnp.float32, 0.1, 10.0)
    mask = jax.random.bernoulli(k3, 0.7, (B, 1, H, W))

    out = jax.block_until_ready(regression_loss(inp, tgt, mask))
    ref = regression_loss_reference(inp, tgt, mask)

    assert out.shape == (B,), out.shape
    assert jnp.allclose(out, ref, rtol=1e-5, atol=1e-5), (out, ref)
    print("KERNEL_OK")
</pallas_src>

<mosaic_0001>
module attributes {stable_mosaic.version = 11 : i64} {
  func.func @_regression_kernel(%arg0: i32, %arg1: i32, %arg2: memref<1x4x256xf32, #tpu.memory_space<vmem>>, %arg3: memref<1x4x256xf32, #tpu.memory_space<vmem>>, %arg4: memref<1x1x256xi8, #tpu.memory_space<vmem>>, %arg5: memref<1x1x128xf32, #tpu.memory_space<vmem>>, %arg6: memref<4x256xf32, #tpu.memory_space<vmem>>, %arg7: memref<1x256xf32, #tpu.memory_space<vmem>>) attributes {dimension_semantics = [#tpu.dimension_semantics<parallel>, #tpu.dimension_semantics<arbitrary>], iteration_bounds = array<i64: 2, 1>, scalar_prefetch = 0 : i64, scratch_operands = 2 : i64, tpu.core_type = #tpu.core_type<tc>, window_params = [{transform_indices = @transform_0, window_bounds = array<i64: 1, 4, 256>}, {transform_indices = @transform_1, window_bounds = array<i64: 1, 4, 256>}, {transform_indices = @transform_2, window_bounds = array<i64: 1, 1, 256>}, {transform_indices = @transform_3, window_bounds = array<i64: 1, 1, 128>}]} {
    %c0_i32 = arith.constant 0 : i32
    %0 = arith.cmpi eq, %arg1, %c0_i32 : i32
    %1 = arith.extui %0 : i1 to i32
    %c0_i32_0 = arith.constant 0 : i32
    %2 = arith.cmpi ne, %1, %c0_i32_0 : i32
    scf.if %2 {
      %cst_21 = arith.constant 0.000000e+00 : f32
      %32 = vector.broadcast %cst_21 : f32 to vector<4x256xf32>
      %c0_22 = arith.constant 0 : index
      %c0_23 = arith.constant 0 : index
      %33 = vector.load %arg6[%c0_22, %c0_23] : memref<4x256xf32, #tpu.memory_space<vmem>>, vector<4x256xf32>
      tpu.vector_store %arg6[%c0_22, %c0_23], %32 {strides = array<i32>} : memref<4x256xf32, #tpu.memory_space<vmem>>, vector<4x256xf32>,
      %cst_24 = arith.constant 0.000000e+00 : f32
      %34 = vector.broadcast %cst_24 : f32 to vector<1x256xf32>
      %c0_25 = arith.constant 0 : index
      %c0_26 = arith.constant 0 : index
      %35 = vector.load %arg7[%c0_25, %c0_26] : memref<1x256xf32, #tpu.memory_space<vmem>>, vector<1x256xf32>
      tpu.vector_store %arg7[%c0_25, %c0_26], %34 {strides = array<i32>} : memref<1x256xf32, #tpu.memory_space<vmem>>, vector<1x256xf32>,
    } else {
    }
    %c0 = arith.constant 0 : index
    %c0_1 = arith.constant 0 : index
    %c0_2 = arith.constant 0 : index
    %3 = vector.load %arg2[%c0, %c0_1, %c0_2] : memref<1x4x256xf32, #tpu.memory_space<vmem>>, vector<1x4x256xf32>
    %4 = vector.shape_cast %3 : vector<1x4x256xf32> to vector<4x256xf32>
    %c0_3 = arith.constant 0 : index
    %c0_4 = arith.constant 0 : index
    %c0_5 = arith.constant 0 : index
    %5 = vector.load %arg3[%c0_3, %c0_4, %c0_5] : memref<1x4x256xf32, #tpu.memory_space<vmem>>, vector<1x4x256xf32>
    %6 = vector.shape_cast %5 : vector<1x4x256xf32> to vector<4x256xf32>
    %7 = arith.subf %4, %6 : vector<4x256xf32>
    %cst = arith.constant 1.000000e+00 : f32
    %8 = vector.broadcast %cst : f32 to vector<4x256xf32>
    %9 = arith.addf %8, %6 : vector<4x256xf32>
    %10 = arith.divf %7, %9 : vector<4x256xf32>
    %11 = math.log1p %10 : vector<4x256xf32>
    %cst_6 = arith.constant 1.000000e+00 : f32
    %12 = vector.broadcast %cst_6 : f32 to vector<4x256xf32>
    %13 = arith.mulf %11, %12 : vector<4x256xf32>
    %14 = arith.mulf %13, %13 : vector<4x256xf32>
    %15 = math.log1p %14 : vector<4x256xf32>
    %cst_7 = arith.constant 1.000000e+00 : f32
    %16 = vector.broadcast %cst_7 : f32 to vector<4x256xf32>
    %17 = arith.mulf %16, %15 : vector<4x256xf32>
    %c0_8 = arith.constant 0 : index
    %c0_9 = arith.constant 0 : index
    %c0_10 = arith.constant 0 : index
    %18 = vector.load %arg4[%c0_8, %c0_9, %c0_10] : memref<1x1x256xi8, #tpu.memory_space<vmem>>, vector<1x1x256xi8>
    %19 = vector.shape_cast %18 : vector<1x1x256xi8> to vector<1x256xi8>
    %20 = arith.sitofp %19 : vector<1x256xi8> to vector<1x256xf32>
    %c0_11 = arith.constant 0 : index
    %c0_12 = arith.constant 0 : index
    %21 = vector.load %arg6[%c0_11, %c0_12] : memref<4x256xf32, #tpu.memory_space<vmem>>, vector<4x256xf32>
    %22 = vector.broadcast %20 : vector<1x256xf32> to vector<4x256xf32>
    %23 = arith.mulf %17, %22 : vector<4x256xf32>
    %24 = arith.addf %21, %23 : vector<4x256xf32>
    %c0_13 = arith.constant 0 : index
    %c0_14 = arith.constant 0 : index
    %25 = vector.load %arg6[%c0_13, %c0_14] : memref<4x256xf32, #tpu.memory_space<vmem>>, vector<4x256xf32>
    tpu.vector_store %arg6[%c0_13, %c0_14], %24 {strides = array<i32>} : memref<4x256xf32, #tpu.memory_space<vmem>>, vector<4x256xf32>,
    %c0_15 = arith.constant 0 : index
    %c0_16 = arith.constant 0 : index
    %26 = vector.load %arg7[%c0_15, %c0_16] : memref<1x256xf32, #tpu.memory_space<vmem>>, vector<1x256xf32>
    %27 = arith.addf %26, %20 : vector<1x256xf32>
    %c0_17 = arith.constant 0 : index
    %c0_18 = arith.constant 0 : index
    %28 = vector.load %arg7[%c0_17, %c0_18] : memref<1x256xf32, #tpu.memory_space<vmem>>, vector<1x256xf32>
    tpu.vector_store %arg7[%c0_17, %c0_18], %27 {strides = array<i32>} : memref<1x256xf32, #tpu.memory_space<vmem>>, vector<1x256xf32>,
    %c0_i32_19 = arith.constant 0 : i32
    %29 = arith.cmpi eq, %arg1, %c0_i32_19 : i32
    %30 = arith.extui %29 : i1 to i32
    %c0_i32_20 = arith.constant 0 : i32
    %31 = arith.cmpi ne, %30, %c0_i32_20 : i32
    scf.if %31 {
      %c0_21 = arith.constant 0 : index
      %c0_22 = arith.constant 0 : index
      %32 = vector.load %arg6[%c0_21, %c0_22] : memref<4x256xf32, #tpu.memory_space<vmem>>, vector<4x256xf32>
      %33 = vector.shape_cast %32 : vector<4x256xf32> to vector<1x4x256xf32>
      %cst_23 = arith.constant dense<0.000000e+00> : vector<1xf32>
      %34 = vector.multi_reduction <add>, %33, %cst_23 [1, 2] : vector<1x4x256xf32> to vector<1xf32>
      %35 = vector.shape_cast %34 : vector<1xf32> to vector<1x1x1xf32>
      %36 = vector.extract %35[0, 0, 0] : f32 from vector<1x1x1xf32>
      %c0_24 = arith.constant 0 : index
      %c0_25 = arith.constant 0 : index
      %37 = vector.load %arg7[%c0_24, %c0_25] : memref<1x256xf32, #tpu.memory_space<vmem>>, vector<1x256xf32>
      %38 = vector.shape_cast %37 : vector<1x256xf32> to vector<1x1x256xf32>
      %cst_26 = arith.constant dense<0.000000e+00> : vector<1xf32>
      %39 = vector.multi_reduction <add>, %38, %cst_26 [1, 2] : vector<1x1x256xf32> to vector<1xf32>
      %40 = vector.shape_cast %39 : vector<1xf32> to vector<1x1x1xf32>
      %41 = vector.extract %40[0, 0, 0] : f32 from vector<1x1x1xf32>
      %cst_27 = arith.constant 1.000000e+00 : f32
      %42 = arith.maximumf %41, %cst_27 : f32
      %cst_28 = arith.constant 4.000000e+00 : f32
      %43 = arith.mulf %cst_28, %42 : f32
      %44 = arith.divf %36, %43 : f32
      %45 = math.sqrt %44 : f32
      %46 = vector.broadcast %45 : f32 to vector<1x128xf32>
      %c0_29 = arith.constant 0 : index
      %c0_30 = arith.constant 0 : index
      %c0_31 = arith.constant 0 : index
      %47 = vector.load %arg5[%c0_29, %c0_30, %c0_31] : memref<1x1x128xf32, #tpu.memory_space<vmem>>, vector<1x1x128xf32>
      %48 = vector.shape_cast %47 : vector<1x1x128xf32> to vector<1x128xf32>
      %49 = vector.shape_cast %46 : vector<1x128xf32> to vector<1x1x128xf32>
      tpu.vector_store %arg5[%c0_29, %c0_30, %c0_31], %49 {strides = array<i32>} : memref<1x1x128xf32, #tpu.memory_space<vmem>>, vector<1x1x128xf32>,
    } else {
    }
    return
  }
  func.func @transform_0(%arg0: i32, %arg1: i32) -> (i32, i32, i32) {
    %c0_i32 = arith.constant 0 : i32
    %c0_i32_0 = arith.constant 0 : i32
    return %arg0, %c0_i32, %arg1 : i32, i32, i32
  }
  func.func @transform_1(%arg0: i32, %arg1: i32) -> (i32, i32, i32) {
    %c0_i32 = arith.constant 0 : i32
    %c0_i32_0 = arith.constant 0 : i32
    return %arg0, %c0_i32, %arg1 : i32, i32, i32
  }
  func.func @transform_2(%arg0: i32, %arg1: i32) -> (i32, i32, i32) {
    %c0_i32 = arith.constant 0 : i32
    %c0_i32_0 = arith.constant 0 : i32
    return %arg0, %c0_i32, %arg1 : i32, i32, i32
  }
  func.func @transform_3(%arg0: i32, %arg1: i32) -> (i32, i32, i32) {
    %c0_i32 = arith.constant 0 : i32
    %c0_i32_0 = arith.constant 0 : i32
    %c0_i32_1 = arith.constant 0 : i32
    return %arg0, %c0_i32, %c0_i32_0 : i32, i32, i32
  }
}

</mosaic_0001>

<bundles_post_ra>
// kernel: tpu_custom_call.1
= control target key start
LH: loop header
LB: loop body
LE: loop exit
PB: predicated region body
PF: predicated region fallthrough
CT: control target
= control target key end

     0   :  { %8 = vsyncpa [#allocation5], 0  ;;  %s988_s0 = inlined_call_operand.hbm [shape: f32[2,4,256], index: 0, kind: input, shape index: {}]   ;;  %s989_s1 = inlined_call_operand.hbm [shape: f32[2,4,256], index: 1, kind: input, shape index: {}]   ;;  %s990_s2 = inlined_call_operand.vmem [shape: s8[2,1,256], index: 2, kind: input, shape index: {}]   ;;  %s991_s3 = inlined_call_operand.hbm [shape: f32[2,1,128], index: 3, kind: output, shape index: {}]  }
   0x1   :  { %10 = vsyncpa [#allocation5 + $0x1], 0 }
   0x2   :  { %11 = vsyncpa [#allocation8], 0 }
   0x3   :  { %13 = vsyncpa [#allocation8 + $0x1], 0 }
   0x4   :  { %14 = vsyncpa [#allocation6], 0 }
   0x5   :  { %16 = vsyncpa [#allocation6 + $0x1], 0  ;;  %s843_s12 = smov 0   ;;  %s845_s13 = smov 0  }
   0x6   :  { %s847_s14 = smov 0   ;;  %s849_s15 = smov 0  }
   0x7   :  { %s851_s16 = smov 0   ;;  %s853_s17 = smov 0  }
   0x8 LB: > { %s568_s18 = sadd.s32 4294967295, %s819_s17   ;;  %s569_s19 = sadd.s32 4294967294, %s819_s17   ;;  %s819_s17 = sphi %s853_s17, %s22_s17   ;;  %s815_s16 = sphi %s851_s16, %s1002_s16   ;;  %s811_s15 = sphi %s849_s15, %s1001_s15   ;;  %s807_s14 = sphi %s847_s14, %s1000_s14   ;;  %s803_s13 = sphi %s845_s13, %s999_s13   ;;  %s799_s12 = sphi %s843_s12, %s998_s12  }
   0x9   : > { %s34_s20 = sadd.s32 1, %s815_s16  ;;  %s43_s21 = sadd.s32 1, %s807_s14 }
   0xa   : > { %p36_p0 = scmp.ge.s32.totalorder %s34_s20, 2  ;;  %p50_p1 = scmp.ne.s32.totalorder %s807_s14, %s803_s13 }
   0xb   : > { %p51_p2 = scmp.eq.s32.totalorder %s819_s17, 0  ;;  %p56_p3 = scmp.ne.s32.totalorder %s803_s13, %s799_s12 }
   0xc   : > { %s1004_s20 = smov (%p36_p0, %s34_s20), 0  ;;  %p57_p5 = scmp.eq.s32.totalorder %s568_s18, 0 }
   0xd   : > { %p884_p4 = por %p51_p2, %p50_p1  ;;  %s38_s23 = ssub.s32 %s815_s16, %s1004_s20 }
   0xe   : > { %p136_p6 = scmp.eq.s32.totalorder %s568_s18, 1  ;;  %p41_p7 = scmp.eq.s32.totalorder %s38_s23, 0 }
   0xf   : > { %p890_p8 = por %p57_p5, %p56_p3  ;;  %p142_p10 = scmp.eq.s32.totalorder %s569_s19, 1 }
  0x10   : > { %p894_p9 = por %p136_p6, %p50_p1  ;;  %p571_p12 = scmp.ge.s32.totalorder %s819_s17, 2 }
  0x11   : > { %s899_s26 = scalar_select %p41_p7, %s807_s14, %s43_s21  }
  0x12   : > { %p901_p11 = por %p142_p10, %p56_p3  ;;  %p611_p13 = scmp.lt.s32.totalorder %s819_s17, 2 }
  0x13   : > { %s162_s28 = sand.u32 1, %s807_s14   ;;  %s584_s30 = sshll.u32 %s815_s16, 3 }
  0x14   : > { %s572_s29 = sshll.u32 %s162_s28, 3  ;;  %s173_s6 = scalar_lea.hbm %s988_s0, %s584_s30 }
  0x15   : > { %s166_s7 = scalar_lea.vmem [#allocation4], %s572_s29  ;;  %s175_s9 = sshll.u32 %s173_s6, 4  ;;  %s176_s9 = int_to_ptr.hbm [resolvable:$true] %s175_s9 }
  0x16   : > { %s177_s8 = sshll.u32 %s166_s7, 4  ;;  %p601_p0 = pnand %p611_p13, %p884_p4  ;;  %s178_s8 = int_to_ptr.vmem [resolvable:$true] %s177_s8 }
  0x17   : > { %p578_p1 = scmp.ge.s32.totalorder %s819_s17, 1  ;;  %p216_p2 = scmp.lt.s32.totalorder %s819_s17, 3 }
  0x18   : > { %s163_s10 = scalar_lea.sflag [#allocation5], %s162_s28  ;;  %s195_s19 = scalar_lea.hbm %s989_s1, %s584_s30 }
  0x19   : > { %603 = dma.hbm_to_vmem [thread:$0]  (!%p601_p0), %s176_s9, 128, %s178_s8, %s163_s10  }
  0x1a   : > { %p217_p3 = pnand %p578_p1, %p216_p2  ;;  %s188_s21 = scalar_lea.vmem [#allocation7], %s572_s29 }
  0x1b   : > { %s199_s23 = sshll.u32 %s188_s21, 4  ;;  %s197_s4 = sshll.u32 %s195_s19, 4  ;;  %s200_s23 = int_to_ptr.vmem [resolvable:$true] %s199_s23  ;;  %s198_s4 = int_to_ptr.hbm [resolvable:$true] %s197_s4 }
  0x1c   : > { %s185_s5 = scalar_lea.sflag [#allocation8], %s162_s28  ;;  %220 = sbr.rel (%p217_p3) target bundleno = 432 (0x1b0), region = 32 }
  0x1d   : > { %606 = dma.hbm_to_vmem [thread:$0]  (!%p601_p0), %s198_s4, 128, %s200_s23, %s185_s5  }
  0x1e   : > { %s920_s22 = sand.u32 (!%p217_p3), 1, %s803_s13  }
  0x1f   : > { %s579_s6 = sshll.u32 (!%p217_p3), %s920_s22, 3  ;;  %s223_s7 = scalar_lea.sflag (!%p217_p3), [#allocation5], %s920_s22 }
  0x20   : > { %s226_s8 = scalar_lea.vmem (!%p217_p3), [#allocation4], %s579_s6 }
  0x21   : > { %786 = dma.done.wait (%p890_p8), %s223_s7, 128  }
  0x22   : > { %788 = vsyncadd (%p890_p8), %s223_s7, 4294967168  ;;  %s233_s29 = scalar_lea.sflag [#allocation8], %s920_s22  ;;  %s236_s28 = scalar_lea.vmem [#allocation7], %s579_s6 }
  0x23   : > { %790 = dma.done.wait (%p890_p8), %s233_s29, 128  }
  0x24   : > { %792 = vsyncadd (%p890_p8), %s233_s29, 4294967168  ;;  %p275_p4 = scmp.lt.s32.totalorder %s811_s15, 1  ;;  %v294_v0 = vld [vmem:[%s236_s28] sm:$0xff]  ;;  %v288_v6 = vlaneseq  ;;  %v293_v9 = vld [vmem:[%s226_s8] sm:$0xff]  ;;  %v821_v13 = vmov 0.0   ;;  %vm353_vm5 = vcmask 1040384   ;;  %s446_s29 = scalar_lea.hbm %s991_s3, %s811_s15 }
  0x25   : > { %v296_v1 = vadd.f32 1.0, %v294_v0  ;;  %v295_v15 = vsub.f32 %v293_v9, %v294_v0  ;;  %vm345_vm7 = vcmask 1043456   ;;  %s822_s21 = smov 1.0   ;;  %s271_s28 = scalar_lea.vmem [#allocation9], %s920_s22 }
  0x26   : > { %s276_s30 = scalar_select %p275_p4, %s811_s15, 1  ;;  %vm938_vm2 = vcmp.lt.s32.totalorder %v288_v6, 256 }
  0x27   : > { %663 = vrcp.f32 %v296_v1  ;;  %v308_v5 = vand.u32 2147483648, %v296_v1  ;;  %vm302_vm0 = vweird.f32 %v296_v1  ;;  %v306_v8 = vand.u32 2147483647, %v296_v1  ;;  %292 = vst.msk [vmem:[#allocation3] sm:$0x3] %vm938_vm2, %v821_v13  ;;  %s438_s11 = scalar_lea.sflag [#allocation6], %s920_s22 }
  0x28   : > { %s581_s9 = sshll.u32 %s276_s30, 1  ;;  %s448_s30 = sshll.u32 %s271_s28, 4  ;;  %s449_s30 = int_to_ptr.vmem [resolvable:$true] %s448_s30 }
  0x29   : > { %s281_s18 = scalar_lea.vmem %s990_s2, %s581_s9  ;;  %v309_v14 = vor.u32 1.1754944e-38, %v308_v5  ;;  %vm307_vm4 = vcmp.eq.f32.partialorder %v306_v8, 8.507059e+37  ;;  %s450_s9 = sshll.u32 %s446_s29, 4  ;;  %s451_s9 = int_to_ptr.hbm [resolvable:$true] %s450_s9 }
  0x2a   : > { %v331_v4 = vld [vmem:[%s281_s18] sm:$0x3]  ;;  %s747_s18 = sshra.s32 %s451_s9, 4  ;;  %s753_s15 = scalar_lea.hbm %s991_s3, 2  ;;  %s748_s18 = int_to_ptr.hbm [resolvable:$true] %s747_s18 }
  0x2b   : > { %v332_v10 = vunpack.c.0.s8 %v331_v4  ;;  %p754_p8 = scmp.lt.s32.totalorder %s748_s18, %s991_s3 }
  0x2d   : > { %v664_v2 = vpop.eup %663  ;;  %v333_v17 = vcvt.s32.f32 %v332_v10 }
  0x2e   : > { %v298_v3 = vmul.f32 %v664_v2, %v296_v1  ;;  %vm303_vm1 = vweird.f32 %v664_v2  ;;  %v351_v22 = vld [vmem:[#allocation3] sm:$0x3] }
  0x2f   : > { %vm304_vm3 = vmor %vm302_vm0, %vm303_vm1  ;;  %v352_v20 = vrot.slane %v333_v17, 3  ;;  %v337_v33 = vperm.slane %v333_v17, 4  ;;  %v336_v37 = vperm.slane %v333_v17, 0 }
  0x30   : > { %v299_v7 = vsub.f32 1.0, %v298_v3 }
  0x31   : > { %v354_v23 = vsel %vm353_vm5, %v333_v17, %v352_v20  ;;  %v341_v38 = vperm.slane %v337_v33, 0  ;;  %v340_v41 = vperm.slane %v336_v37, 0 }
  0x32   : > { %v300_v12 = vmul.f32 %v664_v2, %v299_v7  ;;  %v356_v26 = vadd.f32 %v354_v23, %v351_v22 }
  0x33   : > { %v344_v42 = vrot.slane %v341_v38, 4 }
  0x34   : > { %v301_v16 = vadd.f32 %v664_v2, %v300_v12  ;;  %361 = vst.msk [vmem:[#allocation3] sm:$0x3] %vm938_vm2, %v356_v26 }
  0x35   : > { %v346_v46 = vsel %vm345_vm7, %v340_v41, %v344_v42 }
  0x36   : > { %v305_v18 = vsel %vm304_vm3, %v664_v2, %v301_v16 }
  0x37   : > { %v310_v19 = vsel %vm307_vm4, %v309_v14, %v305_v18 }
  0x38   : > { %v311_v21 = vmul.f32 %v310_v19, %v295_v15 }
  0x3a   : > { %v312_v24 = vadd.f32 1.0, %v311_v21  ;;  %v315_v25 = vmul.f32 -0.5, %v311_v21  ;;  %v318_v28 = vand.u32 2147483647, %v311_v21 }
  0x3b   : > { %v384_v49 = vld [vmem:[#allocation3] sm:$0x3] }
  0x3c   : > { %665 = vlog2.f32 %v312_v24  ;;  %v316_v27 = vadd.f32 1.0, %v315_v25  ;;  %vm319_vm6 = vcmp.lt.f32.partialorder %v318_v28, 0.0004427343  ;;  %v386_v54 = vperm.slane %v384_v49, 0 }
  0x3d   : > { %v387_v55 = vperm.slane %v384_v49, 1 }
  0x3e   : > { %v317_v29 = vmul.f32 %v316_v27, %v311_v21  ;;  %v390_v57 = vsel %vm353_vm5, %v386_v54, 0.0 }
  0x3f   : > { %v391_v58 = vsel %vm353_vm5, %v387_v55, 0.0 }
  0x40   : > { %v392_v59 = vadd.f32 %v391_v58, %v390_v57 }
  0x42   : > { %v666_v30 = vpop.eup %665 }
  0x43   : > { %v314_v31 = vmul.f32 0.6931472, %v666_v30 }
  0x45   : > { %v320_v32 = vsel %vm319_vm6, %v317_v29, %v314_v31 }
  0x46   : > { %v321_v34 = vmul.f32 %v320_v32, %v320_v32 }
  0x48   : > { %v322_v35 = vadd.f32 1.0, %v321_v34  ;;  %v325_v36 = vmul.f32 -0.5, %v321_v34  ;;  %v328_v40 = vand.u32 2147483647, %v321_v34 }
  0x4a   : > { %667 = vlog2.f32 %v322_v35  ;;  %v326_v39 = vadd.f32 1.0, %v325_v36  ;;  %vm329_vm8 = vcmp.lt.f32.partialorder %v328_v40, 0.0004427343 }
  0x4c   : > { %v327_v43 = vmul.f32 %v326_v39, %v321_v34 }
  0x50   : > { %v668_v44 = vpop.eup %667 }
  0x51   : > { %v324_v45 = vmul.f32 0.6931472, %v668_v44 }
  0x53   : > { %v330_v47 = vsel %vm329_vm8, %v327_v43, %v324_v45 }
  0x54   : > { %v348_v48 = vmul.f32 %v346_v46, %v330_v47 }
  0x56   : > { %367 = vst [vmem:[#allocation1] ss:$2 sm:$0xff] %v348_v48 }
  0x5d   : > { %v368_v50 = vld.sshfl [vmem:[#allocation1] sm:$0xff pattern:$0x75316420]  ;;  %v369_v51 = vld.sshfl [vmem:[#allocation1 + $0x8] sm:$0xff pattern:$0x75316420] }
  0x5e   : > { %v372_v52 = vsel %vm345_vm7, %v368_v50, 0.0  ;;  %v373_v53 = vsel %vm345_vm7, %v369_v51, 0.0 }
  0x5f   : > { %v374_v56 = vadd.f32 %v373_v53, %v372_v52 }
  0x61   : > { %375 = vadd.xlane.f32.xlu0 %v374_v56 }
  0x69   : > { %393 = vadd.xlane.f32.xlu0 %v392_v59 }
  0xd4   : > { %v376_v60 = vpop.xlane.xlu0 %375 }
  0xd5   : > { %v377_v61 = vrot.slane %v376_v60, 4 }
  0xd7   : > { %v378_v62 = vadd.f32 %v377_v61, %v376_v60 }
  0xd9   : > { %v379_v63 = vrot.slane %v378_v62, 2 }
  0xdb   : > { %v380_v0 = vadd.f32 %v379_v63, %v378_v62 }
  0xdc   : > { %v394_v1 = vpop.xlane.xlu0 %393 }
  0xdd   : > { %v395_v2 = vrot.slane %v394_v1, 4  ;;  %v381_v3 = vrot.slane %v380_v0, 1 }
  0xdf   : > { %v396_v4 = vadd.f32 %v395_v2, %v394_v1  ;;  %v382_v5 = vadd.f32 %v381_v3, %v380_v0 }
  0xe1   : > { %v397_v6 = vrot.slane %v396_v4, 2  ;;  %586 = vpush %v382_v5 }
  0xe3   : > { %v398_v7 = vadd.f32 %v397_v6, %v396_v4 }
  0xe5   : > { %v399_v8 = vrot.slane %v398_v7, 1 }
  0xe7   : > { %v400_v9 = vadd.f32 %v399_v8, %v398_v7 }
  0xe9   : > { %588 = vpush %v400_v9 }
 0x112   : > { %s587_s24 = spop %586 }
 0x11a   : > { %s589_s19 = spop %588 }
 0x11b   : > { %s402_s23 = smax.f32 %s822_s21, %s589_s19 }
 0x11c   : > { %s403_s4 = smul.f32 4.0, %s402_s23 }
 0x11e   : > { %v404_v10 = vstv %s403_s4 }
 0x11f   : > { %669 = vrcp.f32 %v404_v10  ;;  %v416_v14 = vand.u32 2147483648, %v404_v10  ;;  %v414_v16 = vand.u32 2147483647, %v404_v10  ;;  %vm410_vm10 = vweird.f32 %v404_v10 }
 0x121   : > { %v417_v18 = vor.u32 1.1754944e-38, %v416_v14  ;;  %vm415_vm12 = vcmp.eq.f32.partialorder %v414_v16, 8.507059e+37 }
 0x125   : > { %v670_v11 = vpop.eup %669 }
 0x126   : > { %v406_v12 = vmul.f32 %v670_v11, %v404_v10  ;;  %vm411_vm9 = vweird.f32 %v670_v11 }
 0x127   : > { %vm412_vm11 = vmor %vm410_vm10, %vm411_vm9 }
 0x128   : > { %v407_v13 = vsub.f32 1.0, %v406_v12 }
 0x12a   : > { %v408_v15 = vmul.f32 %v670_v11, %v407_v13 }
 0x12c   : > { %v409_v17 = vadd.f32 %v670_v11, %v408_v15 }
 0x12e   : > { %v413_v19 = vsel %vm412_vm11, %v670_v11, %v409_v17 }
 0x12f   : > { %v418_v20 = vsel %vm415_vm12, %v417_v18, %v413_v19 }
 0x130   : > { %590 = vpush %v418_v20 }
 0x161   : > { %s591_s5 = spop %590 }
 0x162   : > { %s420_s6 = smul.f32 %s591_s5, %s587_s24  ;;  %s749_s24 = scalar_lea.hbm %s748_s18, 1 }
 0x163   : > { %p750_p5 = scmp.ne.s32.totalorder %s748_s18, %s749_s24  ;;  %p755_p10 = scmp.lt.s32.totalorder %s753_s15, %s749_s24 }
 0x164   : > { %v421_v21 = vstv %s420_s6 }
 0x165   : > { %671 = vrsqrt.f32 %v421_v21  ;;  %vm429_vm13 = vcmp.eq.f32.partialorder %v421_v21, inf  ;;  %v432_v29 = vand.u32 2147483648, %v421_v21  ;;  %vm431_vm14 = vcmp.eq.f32.partialorder %v421_v21, 0.0  ;;  %p751_p6 = pnand %p750_p5, %p894_p9  ;;  %p756_p13 = por %p755_p10, %p754_p8 }
 0x167   : > { %p752_p7 = pneg %p751_p6 }
 0x169   : > { %p757_p0 = pnand %p756_p13, %p752_p7 }
 0x16b   : > { %v672_v22 = vpop.eup %671 }
 0x16c   : > { %v423_v23 = vmul.f32 %v672_v22, %v421_v21 }
 0x16e   : > { %v424_v24 = vmul.f32 %v672_v22, %v423_v23 }
 0x170   : > { %v425_v25 = vmul.f32 0.5, %v424_v24 }
 0x172   : > { %v426_v26 = vsub.f32 1.5, %v425_v25 }
 0x174   : > { %v427_v27 = vmul.f32 %v672_v22, %v426_v26 }
 0x176   : > { %v428_v28 = vmul.f32 %v427_v27, %v421_v21 }
 0x178   : > { %v430_v30 = vsel %vm429_vm13, %v421_v21, %v428_v28 }
 0x179   : > { %v433_v31 = vsel %vm431_vm14, %v432_v29, %v430_v30 }
 0x17a   : > { %592 = vpush %v433_v31 }
 0x1ab   : > { %s593_s10 = spop %592 }
 0x1ac   : > { %v435_v32 = vstv %s593_s10 }
 0x1ad   : > { %436 = vst [vmem:[%s271_s28] sm:$0x1] %v435_v32 }
 0x1ae   : > { %760 = shalt.err (!%p757_p0)
}
 0x1af   : > { %598 = dma.vmem_to_hbm [thread:$0]  (%p894_p9), %s449_s30, 16, %s451_s9, %s438_s11  }
 0x1b0 PF: > { %s462_s22 = sand.u32 1, %s799_s12   ;;  %p608_p1 = pnand %p571_p12, %p901_p11 }
 0x1b1   : > { %s463_s5 = scalar_lea.sflag [#allocation6], %s462_s22 }
 0x1b2   : > { %p609_p2 = pneg %p608_p1 }
 0x1b4   : > { %794 = dma.done.wait (%p609_p2), %s463_s5, 16  }
 0x1b5   : > { %796 = vsyncadd (%p609_p2), %s463_s5, 4294967280  ;;  %s22_s17 = sadd.s32 1, %s819_s17   ;;  %s998_s12 = smov %s803_s13 }
 0x1b6   : > { %p19_p3 = scmp.ge.s32.totalorder %s22_s17, 4   ;;  %s999_s13 = smov %s807_s14 }
 0x1b7   : > { %s1000_s14 = smov %s899_s26  ;;  %s1001_s15 = smov %s815_s16 }
 0x1b8   : > { %s1002_s16 = smov %s1004_s20  ;;  %21 = sbr.rel (!%p19_p3) target bundleno = 8 (0x8), region = 101 }
 0x1bd   :  { %468 = vsyncpa [#allocation5], 1 }
 0x1be   :  { %470 = vsyncpa [#allocation5 + $0x1], 1 }
 0x1bf   :  { %471 = vsyncpa [#allocation8], 1 }
 0x1c0   :  { %473 = vsyncpa [#allocation8 + $0x1], 1 }
 0x1c1   :  { %474 = vsyncpa [#allocation6], 1 }
 0x1c2   :  { %476 = vsyncpa [#allocation6 + $0x1], 1 }

</bundles_post_ra>
